<compile_context>
chip_gen: v5e
topology: v5e:2x2
jax: 0.10.0
libtpu: 0.0.40
codegen_flags: <defaults>
</compile_context>

<pallas_src>
import math

import jax
import jax.numpy as jnp
from jax import lax
from jax.experimental import pallas as pl
from jax.experimental.pallas import tpu as pltpu


# ----------------------------- chip / tile sizing ---------------------------

def _vmem_capacity_bytes() -> int:
    """Per-TensorCore VMEM capacity; conservative (v7x) default if the query
    is unavailable in this context."""
    try:
        cap = int(pltpu.get_tpu_info().vmem_capacity_bytes)
        if cap > 0:
            return cap
    except Exception:
        pass
    return 64 << 20


def _round_down(v: int, m: int) -> int:
    return max(m, (v // m) * m)


def _pick_lane_tile(dim: int, cap: int) -> int:
    """Axis that lands in the lane (last) slot of a block: full extent if it
    fits the cap, else the largest 128-multiple <= cap (ragged edge is masked
    by Pallas, so no divisibility requirement)."""
    if dim <= cap:
        return dim
    return _round_down(cap, 128)


def _pick_sublane_tile(dim: int, cap: int, mult: int) -> int:
    """Axis that lands in the sublane (second-to-last) slot: full extent if it
    fits the cap, else the largest dtype-packing multiple <= cap."""
    if dim <= cap:
        return dim
    return _round_down(cap, mult)


# --------------------------------- kernels ----------------------------------

def _make_swap_kernel(mid_in_block: bool, b_blk: int):
    if not mid_in_block:
        # Block is (p, q) or (p, q, c): one whole-block exchange of the two
        # leading axes (2-D XLU transpose when the lane axis is swapped, a
        # lane-fixed sublane<->major relayout otherwise).
        def kernel(x_ref, o_ref):
            o_ref[...] = jnp.swapaxes(x_ref[...], 0, 1)
        return kernel

    # Block is (p, b, q, c) -> (q, b, p, c).  b is a *major* block axis (the
    # lane axis c stays put), so selecting one b index is a cheap contiguous
    # vreg-range slice — no masked sublane extract/insert, stores stay
    # unmasked — and each slice is the same lane-fixed (p,q,c)->(q,p,c)
    # exchange as the no-mid case.
    def _step(bb, x_ref, o_ref):
        o_ref[:, bb] = jnp.swapaxes(x_ref[:, bb], 0, 1)

    if b_blk <= 8:
        def kernel(x_ref, o_ref):
            for bb in range(b_blk):          # short static unroll
                _step(bb, x_ref, o_ref)
    else:
        def kernel(x_ref, o_ref):
            def body(bb, carry):
                _step(bb, x_ref, o_ref)
                return carry
            lax.fori_loop(0, b_blk, body, 0, unroll=4)
    return kernel


# --------------------------------- wrapper ----------------------------------

def pallas_transpose(x: jax.Array, dim0: int, dim1: int) -> jax.Array:
    """torch.Tensor.transpose(dim0, dim1) semantics, computed with Pallas."""
    n = x.ndim
    d0, d1 = dim0 % n, dim1 % n
    if d0 == d1:
        return x
    if d0 > d1:
        d0, d1 = d1, d0

    s = x.shape
    A = math.prod(s[:d0])                        # untouched leading group
    P = s[d0]                                    # first swapped axis
    B = math.prod(s[d0 + 1:d1])                  # untouched middle group
    Q = s[d1]                                    # second swapped axis
    C = math.prod(s[d1 + 1:])                    # untouched trailing group
    out_shape = s[:d0] + (s[d1],) + s[d0 + 1:d1] + (s[d0],) + s[d1 + 1:]

    itemsize = x.dtype.itemsize
    # Degenerate / exotic-dtype cases: P==1 or Q==1 is a pure reshape; let XLA
    # handle empty, >32-bit, complex and bool tensors natively.
    if (x.size == 0 or P == 1 or Q == 1 or itemsize > 4
            or jnp.issubdtype(x.dtype, jnp.complexfloating)
            or x.dtype == jnp.dtype(jnp.bool_)):
        return jnp.swapaxes(x, d0, d1)

    has_mid = B > 1
    has_c = C > 1

    # ---- u32 bit-packing of the untouched trailing group (sub-32-bit) ------
    work_dtype = x.dtype
    C_work, pack = C, 1
    if has_c and itemsize < 4 and (C * itemsize) % 4 == 0 and (C * itemsize) // 4 >= 128:
        pack = 4 // itemsize
        C_work = C // pack
        work_dtype = jnp.uint32
    work_itemsize = jnp.dtype(work_dtype).itemsize

    # Trailing group narrower than 128 lanes -> masked partial stores; XLA's
    # native transpose is the better tool there.
    if has_c and C_work < 128:
        return jnp.swapaxes(x, d0, d1)

    # ---- per-generation tile budget -----------------------------------------
    vmem_cap = _vmem_capacity_bytes()
    budget_bytes = max(1 << 20, vmem_cap // 16)          # 8 MiB v5e/v6e, 4 MiB v7x
    budget_elems = max(8 * 128, budget_bytes // work_itemsize)
    sub_mult = max(8, 32 // work_itemsize)                # dtype-aware sublane step

    if has_c:
        # Last dim untouched: keep the (>=128 wide) trailing group lane-dense
        # in every block; P/Q sit in sublane/major slots.  B (if any) is folded
        # into the block as a major axis so B-dominant shapes keep big tiles.
        c_blk = _pick_lane_tile(C_work, max(128, budget_elems // 512))
        rem = max(1, budget_elems // c_blk)
        q_blk = _pick_sublane_tile(Q, max(sub_mult, math.isqrt(rem)), sub_mult)
        p_blk = _pick_sublane_tile(P, max(sub_mult, rem // q_blk), sub_mult)
        b_blk = min(B, max(1, rem // (q_blk * p_blk))) if has_mid else 1
        mid_in_block = has_mid
    else:
        # Swap involves the last (lane) axis: 128-multiple / full-extent p,q
        # tiles -> one big XLU transpose per block, unmasked lane-dense stores.
        # q (input lane dim) gets the larger share (v5e single store slot).
        c_blk = 1
        q_blk = _pick_lane_tile(Q, max(128, budget_elems // 256))
        p_blk = _pick_lane_tile(P, max(128, budget_elems // q_blk))
        b_blk = 1
        mid_in_block = False

    in_view = (A, P) + ((B,) if has_mid else ()) + (Q,) + ((C_work,) if has_c else ())
    out_view = (A, Q) + ((B,) if has_mid else ()) + (P,) + ((C_work,) if has_c else ())

    mid_blk = ((b_blk if mid_in_block else None,) if has_mid else ())
    in_block = (None, p_blk) + mid_blk + (q_blk,) + ((c_blk,) if has_c else ())
    out_block = (None, q_blk) + mid_blk + (p_blk,) + ((c_blk,) if has_c else ())

    def in_index(a, b, i, j, c):
        return tuple([a, i] + ([b] if has_mid else [])
                     + [j] + ([c] if has_c else []))

    def out_index(a, b, i, j, c):
        return tuple([a, j] + ([b] if has_mid else [])
                     + [i] + ([c] if has_c else []))

    gb = (pl.cdiv(B, b_blk) if mid_in_block else B) if has_mid else 1
    grid = (A, gb, pl.cdiv(P, p_blk), pl.cdiv(Q, q_blk),
            pl.cdiv(C_work, c_blk) if has_c else 1)

    tile_bytes = p_blk * q_blk * b_blk * c_blk * work_itemsize
    vmem_need = 4 * tile_bytes + (4 << 20)        # in+out, double-buffered, slack
    vmem_limit = int(min(max(vmem_need, 32 << 20), (vmem_cap * 3) // 4))

    xv = x.reshape((A, P) + ((B,) if has_mid else ()) + (Q,) + ((C,) if has_c else ()))
    if pack > 1:
        xv = lax.bitcast_convert_type(
            xv.reshape(xv.shape[:-1] + (C_work, pack)), jnp.uint32)

    out = pl.pallas_call(
        _make_swap_kernel(mid_in_block, b_blk),
        out_shape=jax.ShapeDtypeStruct(out_view, work_dtype),
        grid=grid,
        in_specs=[pl.BlockSpec(in_block, in_index)],
        out_specs=pl.BlockSpec(out_block, out_index),
        compiler_params=pltpu.CompilerParams(
            dimension_semantics=("parallel",) * len(grid),
            vmem_limit_bytes=vmem_limit),
        cost_estimate=pl.CostEstimate(flops=0, transcendentals=0,
                                      bytes_accessed=2 * x.size * itemsize),
    )(xv)

    if pack > 1:
        out = lax.bitcast_convert_type(out, x.dtype).reshape(out_view[:-1] + (C,))
    return out.reshape(out_shape)


class Transpose:
    """JAX/Pallas port of the PyTorch `Transpose` module."""

    def __init__(self, *dims, contiguous: bool = False):
        assert len(dims) == 2, "Transpose expects exactly two dims"
        self.dims = dims
        # `.contiguous()` has no semantic effect on immutable JAX arrays.
        self.contiguous = contiguous

    def __call__(self, x: jax.Array) -> jax.Array:
        return pallas_transpose(x, *self.dims)


if __name__ == "__main__":
    key = jax.random.PRNGKey(0)
    k1, k2, k3, k4, k5, k6 = jax.random.split(key, 6)
    ok = True

    def check(y, ref, shape):
        return y.shape == shape and bool(jnp.array_equal(y, ref))

    # Case 1: NCHW input, swap two non-lane axes with a tiny trailing dim
    # (C = 16 < 128 -> deliberate XLA-native fallback path).
    x = jax.random.normal(k1, (2, 4, 16, 16), dtype=jnp.float32)
    y = jax.block_until_ready(Transpose(1, 2)(x))
    ok &= check(y, jnp.swapaxes(x, 1, 2), (2, 16, 4, 16))

    # Case 2: swap the last two axes (lane-swap Pallas path, small tiles).
    y = jax.block_until_ready(Transpose(2, 3, contiguous=True)(x))
    ok &= check(y, jnp.swapaxes(x, 2, 3), (2, 4, 16, 16))

    # Case 3: negative dims on a (batch, seq, hidden) tensor.
    z = jax.random.normal(k2, (2, 8, 32), dtype=jnp.float32)
    y = jax.block_until_ready(Transpose(-1, -2)(z))
    ok &= check(y, jnp.swapaxes(z, -1, -2), (2, 32, 8))

    # Case 4: 128-multiple lane-swap tiles (big 2-D XLU transpose per block).
    w = jax.random.normal(k3, (2, 512, 640), dtype=jnp.float32)
    y = jax.block_until_ready(Transpose(-1, -2)(w))
    ok &= check(y, jnp.swapaxes(w, -1, -2), (2, 640, 512))

    # Case 5: untouched lane-dense trailing group, bf16 -> u32 bit-packing.
    h = jax.random.normal(k4, (2, 4, 16, 256), dtype=jnp.bfloat16)
    y = jax.block_until_ready(Transpose(1, 2)(h))
    ok &= check(y, jnp.swapaxes(h, 1, 2), (2, 16, 4, 256))

    # Case 6: non-adjacent swap with untouched middle group B inside the block
    # (lane-fixed path, per-b major-axis slices).
    g = jax.random.normal(k5, (4, 8, 16, 256), dtype=jnp.float32)
    y = jax.block_until_ready(Transpose(0, 2)(g))
    ok &= check(y, jnp.swapaxes(g, 0, 2), (16, 8, 4, 256))

    # Case 7: non-adjacent swap involving the last axis (B stays a grid axis).
    t = jax.random.normal(k6, (2, 4, 6, 16), dtype=jnp.float32)
    y = jax.block_until_ready(Transpose(1, 3)(t))
    ok &= check(y, jnp.swapaxes(t, 1, 3), (2, 16, 6, 4))

    if ok:
        print("KERNEL_OK")
    else:
        raise SystemExit("mismatch vs reference transpose")
</pallas_src>

<mosaic_0001>
module attributes {stable_mosaic.version = 11 : i64} {
  func.func @kernel(%arg0: i32, %arg1: i32, %arg2: i32, %arg3: i32, %arg4: i32, %arg5: memref<1x16x16xf32, #tpu.memory_space<vmem>>, %arg6: memref<1x16x16xf32, #tpu.memory_space<vmem>>) attributes {dimension_semantics = [#tpu.dimension_semantics<parallel>, #tpu.dimension_semantics<parallel>, #tpu.dimension_semantics<parallel>, #tpu.dimension_semantics<parallel>, #tpu.dimension_semantics<parallel>], iteration_bounds = array<i64: 8, 1, 1, 1, 1>, scalar_prefetch = 0 : i64, scratch_operands = 0 : i64, tpu.core_type = #tpu.core_type<tc>, window_params = [{transform_indices = @transform_0, window_bounds = array<i64: 1, 16, 16>}, {transform_indices = @transform_1, window_bounds = array<i64: 1, 16, 16>}]} {
    %c0 = arith.constant 0 : index
    %c0_0 = arith.constant 0 : index
    %c0_1 = arith.constant 0 : index
    %0 = vector.load %arg5[%c0, %c0_0, %c0_1] : memref<1x16x16xf32, #tpu.memory_space<vmem>>, vector<1x16x16xf32>
    %1 = vector.shape_cast %0 : vector<1x16x16xf32> to vector<16x16xf32>
    %2 = tpu.transpose %1, [1, 0] : vector<16x16xf32> -> vector<16x16xf32>
    %c0_2 = arith.constant 0 : index
    %c0_3 = arith.constant 0 : index
    %c0_4 = arith.constant 0 : index
    %3 = vector.load %arg6[%c0_2, %c0_3, %c0_4] : memref<1x16x16xf32, #tpu.memory_space<vmem>>, vector<1x16x16xf32>
    %4 = vector.shape_cast %3 : vector<1x16x16xf32> to vector<16x16xf32>
    %5 = vector.shape_cast %2 : vector<16x16xf32> to vector<1x16x16xf32>
    tpu.vector_store %arg6[%c0_2, %c0_3, %c0_4], %5 {strides = array<i32>} : memref<1x16x16xf32, #tpu.memory_space<vmem>>, vector<1x16x16xf32>,
    return
  }
  func.func @transform_0(%arg0: i32, %arg1: i32, %arg2: i32, %arg3: i32, %arg4: i32) -> (i32, i32, i32) {
    %c0_i32 = arith.constant 0 : i32
    return %arg0, %arg2, %arg3 : i32, i32, i32
  }
  func.func @transform_1(%arg0: i32, %arg1: i32, %arg2: i32, %arg3: i32, %arg4: i32) -> (i32, i32, i32) {
    %c0_i32 = arith.constant 0 : i32
    return %arg0, %arg3, %arg2 : i32, i32, i32
  }
}

</mosaic_0001>

<bundles_post_ra>
// kernel: tpu_custom_call.1
= control target key start
LH: loop header
LB: loop body
LE: loop exit
PB: predicated region body
PF: predicated region fallthrough
CT: control target
= control target key end

     0   :  { %6 = vsyncpa [#allocation3], 0  ;;  %s661_s0 = inlined_call_operand.hbm [shape: f32[8,16,16], index: 0, kind: input, shape index: {}]   ;;  %s662_s1 = inlined_call_operand.hbm [shape: f32[8,16,16], index: 1, kind: output, shape index: {}]  }
   0x1   :  { %8 = vsyncpa [#allocation3 + $0x1], 0 }
   0x2   :  { %9 = vsyncpa [#allocation4], 0 }
   0x3   :  { %11 = vsyncpa [#allocation4 + $0x1], 0  ;;  %s543_s6 = smov 0   ;;  %s545_s7 = smov 0  }
   0x4   :  { %s547_s8 = smov 0   ;;  %s549_s9 = smov 0  }
   0x5   :  { %s551_s10 = smov 0   ;;  %s553_s11 = smov 0  }
   0x6 LB: > { %s331_s12 = sadd.s32 4294967295, %s527_s11   ;;  %s332_s13 = sadd.s32 4294967294, %s527_s11   ;;  %s527_s11 = sphi %s553_s11, %s17_s11   ;;  %s523_s10 = sphi %s551_s10, %s671_s10   ;;  %s519_s9 = sphi %s549_s9, %s670_s9   ;;  %s515_s8 = sphi %s547_s8, %s669_s8   ;;  %s511_s7 = sphi %s545_s7, %s668_s7   ;;  %s507_s6 = sphi %s543_s6, %s667_s6  }
   0x7   : > { %s50_s14 = sadd.s32 1, %s523_s10  ;;  %s61_s15 = sadd.s32 1, %s515_s8 }
   0x8   : > { %p52_p0 = scmp.ge.s32.totalorder %s50_s14, 8  ;;  %p68_p1 = scmp.ne.s32.totalorder %s515_s8, %s511_s7 }
   0x9   : > { %p69_p2 = scmp.eq.s32.totalorder %s527_s11, 0  ;;  %p74_p3 = scmp.ne.s32.totalorder %s511_s7, %s507_s6 }
   0xa   : > { %s673_s14 = smov (%p52_p0, %s50_s14), 0  ;;  %p75_p5 = scmp.eq.s32.totalorder %s331_s12, 0 }
   0xb   : > { %p584_p4 = por %p69_p2, %p68_p1  ;;  %s54_s17 = ssub.s32 %s523_s10, %s673_s14 }
   0xc   : > { %p102_p6 = scmp.eq.s32.totalorder %s331_s12, 7  ;;  %p59_p7 = scmp.eq.s32.totalorder %s54_s17, 0 }
   0xd   : > { %p590_p8 = por %p75_p5, %p74_p3  ;;  %p108_p10 = scmp.eq.s32.totalorder %s332_s13, 7 }
   0xe   : > { %p594_p9 = por %p102_p6, %p68_p1  ;;  %p360_p12 = scmp.lt.s32.totalorder %s527_s11, 8 }
   0xf   : > { %s599_s20 = scalar_select %p59_p7, %s515_s8, %s61_s15  }
  0x10   : > { %p601_p11 = por %p108_p10, %p74_p3  ;;  %s128_s22 = sand.u32 1, %s515_s8  }
  0x11   : > { %s335_s23 = sshll.u32 %s128_s22, 4  ;;  %s346_s24 = sshll.u32 %s523_s10, 4 }
  0x12   : > { %s140_s27 = scalar_lea.hbm %s661_s0, %s346_s24  ;;  %s132_s28 = scalar_lea.vmem [#allocation2], %s335_s23 }
  0x13   : > { %s143_s29 = sshll.u32 %s132_s28, 4  ;;  %s141_s30 = sshll.u32 %s140_s27, 4  ;;  %s144_s29 = int_to_ptr.vmem [resolvable:$true] %s143_s29  ;;  %s142_s30 = int_to_ptr.hbm [resolvable:$true] %s141_s30 }
  0x14   : > { %p353_p13 = pnand %p360_p12, %p584_p4  ;;  %p338_p0 = scmp.ge.s32.totalorder %s527_s11, 1 }
  0x15   : > { %s129_s2 = scalar_lea.sflag [#allocation3], %s128_s22  ;;  %s529_s3 = smov 128  }
  0x16   : > { %s530_s4 = smov 8   ;;  %p151_p1 = scmp.lt.s32.totalorder %s527_s11, 9 }
  0x17   : > { %355 = dma.hbm_to_vmem [thread:$0]  (!%p353_p13), %s142_s30, 256, %s144_s29, %s129_s2, %s529_s3, %s529_s3, %s530_s4  }
  0x18   : > { %p152_p2 = pnand %p338_p0, %p151_p1 }
  0x19   : > { %s616_s5 = sand.u32 (!%p152_p2), 1, %s511_s7  }
  0x1a   : > { %155 = sbr.rel (%p152_p2) target bundleno = 210 (0xd2), region = 24  ;;  %s339_s12 = sshll.u32 (!%p152_p2), %s616_s5, 4 }
  0x1b   : > { %s158_s13 = scalar_lea.sflag (!%p152_p2), [#allocation3], %s616_s5  ;;  %s161_s15 = scalar_lea.vmem (!%p152_p2), [#allocation2], %s339_s12 }
  0x1f   : > { %498 = dma.done.wait (%p590_p8), %s158_s13, 256  }
  0x20   : > { %500 = vsyncadd (%p590_p8), %s158_s13, 4294967040  ;;  %v183_v0 = vld [vmem:[%s161_s15] sm:$0xff]  ;;  %v184_v1 = vld [vmem:[%s161_s15 + $0x8] sm:$0xff]  ;;  %s347_s16 = sshll.u32 %s519_s9, 4  ;;  %vm217_vm0 = vcmask 130048   ;;  %s180_s24 = scalar_lea.vmem [#allocation5], %s339_s12 }
  0x21   : > { %185 = vxpose.xlu0.b32.start [1/2] (short) (narrow) %v183_v0, 16  ;;  %s235_s23 = scalar_lea.hbm %s662_s1, %s347_s16  ;;  %s236_s25 = sshll.u32 %s180_s24, 4  ;;  %s237_s25 = int_to_ptr.vmem [resolvable:$true] %s236_s25 }
  0x22   : > { %s238_s26 = sshll.u32 %s235_s23, 4  ;;  %s221_s18 = scalar_lea.sflag [#allocation4], %s616_s5  ;;  %s239_s26 = int_to_ptr.hbm [resolvable:$true] %s238_s26 }
  0x23   : > { %s459_s27 = sshra.s32 %s239_s26, 4  ;;  %s465_s30 = scalar_lea.hbm %s662_s1, 128  ;;  %s460_s27 = int_to_ptr.hbm [resolvable:$true] %s459_s27 }
  0x24   : > { %s461_s28 = scalar_lea.hbm %s460_s27, 16  ;;  %p466_p6 = scmp.lt.s32.totalorder %s460_s27, %s662_s1 }
  0x25   : > { %p462_p3 = scmp.ne.s32.totalorder %s460_s27, %s461_s28  ;;  %p467_p7 = scmp.lt.s32.totalorder %s465_s30, %s461_s28 }
  0x27   : > { %p463_p4 = pnand %p462_p3, %p594_p9  ;;  %p468_p8 = por %p467_p7, %p466_p6 }
  0x29   : > { %186 = vxpose.xlu0.b32.end [2/2] (short) (narrow) %v184_v1, 16  ;;  %p464_p5 = pneg %p463_p4 }
  0x2b   : > { %p469_p10 = pnand %p468_p8, %p464_p5 }
  0xc5   : > { %v201_v2 = vpop.trf.xlu0 }
  0xc6   : > { %218 = vst.msk [vmem:[%s180_s24] sm:$0xff] %vm217_vm0, %v201_v2 }
  0xcd   : > { %v202_v3 = vpop.trf.xlu0 }
  0xce   : > { %219 = vst.msk [vmem:[%s180_s24 + $0x8] sm:$0xff] %vm217_vm0, %v202_v3 }
  0xcf   : > { %472 = shalt.err (!%p469_p10)
}
  0xd0   : > { %s531_s4 = smov 128   ;;  %s532_s5 = smov 8  }
  0xd1   : > { %350 = dma.vmem_to_hbm [thread:$0]  (%p594_p9), %s237_s25, 256, %s239_s26, %s221_s18, %s531_s4, %s531_s4, %s532_s5  }
  0xd2 PF: > { %p361_p12 = scmp.ge.s32.totalorder %s527_s11, 2  ;;  %s253_s12 = sand.u32 1, %s507_s6  }
  0xd3   : > { %s254_s13 = scalar_lea.sflag [#allocation4], %s253_s12 }
  0xd4   : > { %p357_p13 = pnand %p361_p12, %p601_p11 }
  0xd6   : > { %p358_p0 = pneg %p357_p13 }
  0xd8   : > { %502 = dma.done.wait (%p358_p0), %s254_s13, 256  }
  0xd9   : > { %504 = vsyncadd (%p358_p0), %s254_s13, 4294967040  ;;  %s17_s11 = sadd.s32 1, %s527_s11   ;;  %s667_s6 = smov %s511_s7 }
  0xda   : > { %p14_p1 = scmp.ge.s32.totalorder %s17_s11, 10   ;;  %s668_s7 = smov %s515_s8 }
  0xdb   : > { %s669_s8 = smov %s599_s20  ;;  %s670_s9 = smov %s523_s10 }
  0xdc   : > { %s671_s10 = smov %s673_s14  ;;  %16 = sbr.rel (!%p14_p1) target bundleno = 6 (0x6), region = 69 }
  0xe1   :  { %260 = vsyncpa [#allocation3], 1 }
  0xe2   :  { %262 = vsyncpa [#allocation3 + $0x1], 1 }
  0xe3   :  { %263 = vsyncpa [#allocation4], 1 }
  0xe4   :  { %265 = vsyncpa [#allocation4 + $0x1], 1 }

</bundles_post_ra>
